<compile_context>
chip_gen: v6e
topology: v6e:2x2x1
jax: 0.10.0
libtpu: 0.0.40
codegen_flags: <defaults>
</compile_context>

<pallas_src>
import jax
import jax.numpy as jnp
from jax import lax
from jax.experimental import pallas as pl
from jax.experimental.pallas import tpu as pltpu


CHUNK = 128        # block-recursion length == MXU tile (256 also works on v6e/v7x)
B_TILE = 128       # batch rows per block when the batch is large
T_TILE_MAX = 2048  # default time columns per grid step (multiple of CHUNK)


def _diir_kernel(lt_ref, qt_ref, state0_ref, x_ref, out_ref, state_sc):
    """One (b_tile, t_tile) block of the biquad, in native (B, T) layout.

    lt_ref:     (CHUNK, CHUNK)   f32  L^T, LT[s, t] = h_full[t - s] (upper-tri)
    qt_ref:     (8, CHUNK)       f32  Q^T, boundary-state impulse responses
    state0_ref: (b_tile, 8)      f32  initial state [x[-2], x[-1], y[-2], y[-1], 0...]
    x_ref:      (b_tile, t_tile) f32  input tile
    out_ref:    (b_tile, t_tile) f32  output tile
    state_sc:   (b_tile, 8)      f32  VMEM scratch carrying state across time tiles
    """
    t_idx = pl.program_id(1)

    @pl.when(t_idx == 0)
    def _():
        state_sc[...] = state0_ref[...]

    b = x_ref.shape[0]
    n_chunks = x_ref.shape[1] // CHUNK

    def chunk_body(c, state):
        c0 = pl.multiple_of(c * CHUNK, CHUNK)
        xc = x_ref[:, pl.ds(c0, CHUNK)]                               # (b, CHUNK)
        # Whole-chunk recurrence as two MXU matmuls with f32 accumulation.
        yc = jnp.dot(xc, lt_ref[...], preferred_element_type=jnp.float32)
        yc = yc + jnp.dot(state, qt_ref[...], preferred_element_type=jnp.float32)
        out_ref[:, pl.ds(c0, CHUNK)] = yc                             # lane-dense store
        # Boundary state for the next chunk: last two x / y columns of this chunk.
        return jnp.concatenate(
            [xc[:, CHUNK - 2:CHUNK], yc[:, CHUNK - 2:CHUNK],
             jnp.zeros((b, 4), jnp.float32)], axis=1)

    state = lax.fori_loop(0, n_chunks, chunk_body, state_sc[...],
                          unroll=min(2, n_chunks))
    # Carry the state to the next time tile.
    state_sc[...] = state


def _build_operators(coef, chunk=CHUNK):
    """Precompute L^T (chunk, chunk) and Q^T (8, chunk) for the block recursion."""
    coef = jnp.asarray(coef, jnp.float32)
    b0, b1, b2, a1, a2 = [coef[i] for i in range(5)]

    # AR-part impulse response: h[0] = 1, h[n] = -a1*h[n-1] - a2*h[n-2].
    def step(carry, _):
        hm1, hm2 = carry
        h = -a1 * hm1 - a2 * hm2
        return (h, hm1), h

    _, h_tail = lax.scan(step, (jnp.float32(1.0), jnp.float32(0.0)),
                         None, length=chunk - 1)
    h = jnp.concatenate([jnp.ones((1,), jnp.float32), h_tail])        # h[n]
    hm1 = jnp.concatenate([jnp.zeros((1,), jnp.float32), h[:-1]])     # h[n-1]
    hm2 = jnp.concatenate([jnp.zeros((2,), jnp.float32), h[:-2]])     # h[n-2]
    h_full = b0 * h + b1 * hm1 + b2 * hm2                             # full biquad IR

    t = jnp.arange(chunk)
    d = t[:, None] - t[None, :]
    l_mat = jnp.where(d >= 0, h_full[jnp.clip(d, 0, chunk - 1)], 0.0)  # (chunk, chunk)

    # Boundary-state responses, state order = [x[-2], x[-1], y[-2], y[-1], 0,0,0,0].
    zero = jnp.zeros_like(h)
    q = jnp.stack([b2 * h,                    # x[-2]
                   b1 * h + b2 * hm1,         # x[-1]
                   -a2 * h,                   # y[-2]
                   -a1 * h - a2 * hm1,        # y[-1]
                   zero, zero, zero, zero], axis=1)                    # (chunk, 8)
    return l_mat.T.astype(jnp.float32), q.T.astype(jnp.float32)


def _round_up(n, m):
    return ((n + m - 1) // m) * m


def diir_forward(x, coef, initial_states=None, t_tile_max=T_TILE_MAX):
    """Mirrors DIIR_WRAPPER.forward for the biquad cell.

    x: (B, T, 1) float32;  coef: (5,) [b0, b1, b2, a1, a2]
    initial_states: optional (4, B) [x[t-1], x[t-2], y[t-1], y[t-2]]
    Returns (B, T, 1), or ((B, T, 1), final_states) when initial_states is given.
    """
    x = jnp.asarray(x, jnp.float32)
    B, T, _ = x.shape

    lt, qt = _build_operators(coef)

    # Batch tiling: small batches stay a single sublane-aligned block.
    if B >= B_TILE:
        b_tile = B_TILE
        b_pad = _round_up(B, B_TILE)
    else:
        b_tile = _round_up(B, 8)
        b_pad = b_tile
    # Time tiling: multiple of CHUNK, capped by t_tile_max.
    t_tile = max(CHUNK, (t_tile_max // CHUNK) * CHUNK)
    t_tile = min(t_tile, _round_up(T, CHUNK))
    t_pad = _round_up(T, t_tile)

    x2d = x[..., 0]                                     # (B, T): free squeeze
    if (b_pad, t_pad) != (B, T):
        x2d = jnp.pad(x2d, ((0, b_pad - B), (0, t_pad - T)))

    state0 = jnp.zeros((b_pad, 8), jnp.float32)
    if initial_states is not None:
        st = jnp.asarray(initial_states, jnp.float32).reshape(4, B)   # [x1,x2,y1,y2]
        state0 = state0.at[:B, 0].set(st[1])   # x[t-2]
        state0 = state0.at[:B, 1].set(st[0])   # x[t-1]
        state0 = state0.at[:B, 2].set(st[3])   # y[t-2]
        state0 = state0.at[:B, 3].set(st[2])   # y[t-1]

    grid = (b_pad // b_tile, t_pad // t_tile)
    out2d = pl.pallas_call(
        _diir_kernel,
        out_shape=jax.ShapeDtypeStruct((b_pad, t_pad), jnp.float32),
        grid=grid,
        in_specs=[
            pl.BlockSpec((CHUNK, CHUNK), lambda bi, ti: (0, 0)),       # L^T (resident)
            pl.BlockSpec((8, CHUNK), lambda bi, ti: (0, 0)),           # Q^T (resident)
            pl.BlockSpec((b_tile, 8), lambda bi, ti: (bi, 0)),         # init state
            pl.BlockSpec((b_tile, t_tile), lambda bi, ti: (bi, ti)),   # x tile
        ],
        out_specs=pl.BlockSpec((b_tile, t_tile), lambda bi, ti: (bi, ti)),
        scratch_shapes=[pltpu.VMEM((b_tile, 8), jnp.float32)],
        compiler_params=pltpu.CompilerParams(
            dimension_semantics=("parallel", "arbitrary"),
            # In/out double-buffered tiles are ~4 MiB at default sizes; keep the
            # scoped limit well under v7x's 64 MiB physical VMEM.
            vmem_limit_bytes=32 * 1024 * 1024),
    )(lt, qt, state0, x2d)

    out_seq = out2d[:B, :T][..., None]                  # (B, T, 1)

    if initial_states is None:
        return out_seq

    # Final cell state (x[T-1], x[T-2], y[T-1], y[T-2]) recovered wrapper-side.
    xt = x[..., 0]
    yt = out_seq[..., 0]
    x1 = xt[:, T - 1]
    y1 = yt[:, T - 1]
    if T >= 2:
        x2 = xt[:, T - 2]
        y2 = yt[:, T - 2]
    else:
        st = jnp.asarray(initial_states, jnp.float32).reshape(4, B)
        x2 = st[0]
        y2 = st[2]
    return out_seq, jnp.stack([x1, x2, y1, y2], axis=0)


def _reference(x, coef, initial_states=None):
    """Sequential pure-JAX reference of the same recurrence (sanity check)."""
    coef = jnp.asarray(coef, jnp.float32)
    b0, b1, b2, a1, a2 = [coef[i] for i in range(5)]
    B, T, _ = x.shape
    if initial_states is None:
        x1 = x2 = y1 = y2 = jnp.zeros((B,), jnp.float32)
    else:
        st = jnp.asarray(initial_states, jnp.float32).reshape(4, B)
        x1, x2, y1, y2 = st[0], st[1], st[2], st[3]

    def step(carry, xt):
        cx1, cx2, cy1, cy2 = carry
        yt = b0 * xt + b1 * cx1 + b2 * cx2 - a1 * cy1 - a2 * cy2
        return (xt, cx1, yt, cy1), yt

    (x1, x2, y1, y2), ys = lax.scan(step, (x1, x2, y1, y2),
                                    jnp.transpose(x[..., 0], (1, 0)))
    out = jnp.transpose(ys, (1, 0))[..., None]
    return out, jnp.stack([x1, x2, y1, y2], axis=0)


if __name__ == "__main__":
    key = jax.random.PRNGKey(0)
    k1, k2, k3 = jax.random.split(key, 3)

    # Deterministic, stable biquad coefficients [b0, b1, b2, a1, a2].
    coef = jnp.array([0.2, 0.3, 0.1, -0.5, 0.2], dtype=jnp.float32)

    # Case 1: B=4, T=16 (single time tile / single chunk; initial_states=None).
    x_a = jax.random.normal(k1, (4, 16, 1), dtype=jnp.float32)
    out_a = jax.block_until_ready(diir_forward(x_a, coef))
    assert out_a.shape == (4, 16, 1), out_a.shape
    ref_a, _ = _reference(x_a, coef)
    err_a = float(jnp.max(jnp.abs(out_a - ref_a)))
    assert err_a < 2e-3, err_a

    # Case 2: B=2, T=300 with initial states and t_tile_max=256 -> two time
    # tiles of two chunks each: exercises the in-tile chunk recursion, the
    # VMEM-scratch state carry across grid iterations, and time padding.
    x_b = jax.random.normal(k2, (2, 300, 1), dtype=jnp.float32)
    st0 = 0.5 * jax.random.normal(k3, (4, 2), dtype=jnp.float32)
    out_b, st_b = diir_forward(x_b, coef, initial_states=st0, t_tile_max=256)
    out_b = jax.block_until_ready(out_b)
    assert out_b.shape == (2, 300, 1), out_b.shape
    ref_b, ref_st = _reference(x_b, coef, st0)
    err_b = float(jnp.max(jnp.abs(out_b - ref_b)))
    err_st = float(jnp.max(jnp.abs(st_b - ref_st)))
    assert err_b < 2e-3, err_b
    assert err_st < 2e-3, err_st

    print("KERNEL_OK")
</pallas_src>

<mosaic_0001>
module attributes {stable_mosaic.version = 11 : i64} {
  func.func @_diir_kernel(%arg0: i32, %arg1: i32, %arg2: memref<128x128xf32, #tpu.memory_space<vmem>>, %arg3: memref<8x128xf32, #tpu.memory_space<vmem>>, %arg4: memref<8x8xf32, #tpu.memory_space<vmem>>, %arg5: memref<8x128xf32, #tpu.memory_space<vmem>>, %arg6: memref<8x128xf32, #tpu.memory_space<vmem>>, %arg7: memref<8x8xf32, #tpu.memory_space<vmem>>) attributes {dimension_semantics = [#tpu.dimension_semantics<parallel>, #tpu.dimension_semantics<arbitrary>], iteration_bounds = array<i64: 1, 1>, scalar_prefetch = 0 : i64, scratch_operands = 1 : i64, tpu.core_type = #tpu.core_type<tc>, window_params = [{pipeline_mode = #tpu.pipeline_mode<synchronous>, transform_indices = @transform_0, window_bounds = array<i64: 128, 128>}, {pipeline_mode = #tpu.pipeline_mode<synchronous>, transform_indices = @transform_1, window_bounds = array<i64: 8, 128>}, {transform_indices = @transform_2, window_bounds = array<i64: 8, 8>}, {transform_indices = @transform_3, window_bounds = array<i64: 8, 128>}, {transform_indices = @transform_4, window_bounds = array<i64: 8, 128>}]} {
    %c0_i32 = arith.constant 0 : i32
    %0 = arith.cmpi eq, %arg1, %c0_i32 : i32
    %1 = arith.extui %0 : i1 to i32
    %c0_i32_0 = arith.constant 0 : i32
    %2 = arith.cmpi ne, %1, %c0_i32_0 : i32
    scf.if %2 {
      %c0_13 = arith.constant 0 : index
      %c0_14 = arith.constant 0 : index
      %20 = vector.load %arg4[%c0_13, %c0_14] : memref<8x8xf32, #tpu.memory_space<vmem>>, vector<8x8xf32>
      %c0_15 = arith.constant 0 : index
      %c0_16 = arith.constant 0 : index
      %21 = vector.load %arg7[%c0_15, %c0_16] : memref<8x8xf32, #tpu.memory_space<vmem>>, vector<8x8xf32>
      tpu.vector_store %arg7[%c0_15, %c0_16], %20 {strides = array<i32>} : memref<8x8xf32, #tpu.memory_space<vmem>>, vector<8x8xf32>,
    } else {
    }
    %c0 = arith.constant 0 : index
    %c0_1 = arith.constant 0 : index
    %3 = vector.load %arg7[%c0, %c0_1] : memref<8x8xf32, #tpu.memory_space<vmem>>, vector<8x8xf32>
    %c0_i32_2 = arith.constant 0 : i32
    %c128_i32 = arith.constant 128 : i32
    %4 = arith.muli %c0_i32_2, %c128_i32 : i32
    %5 = tpu.assume_multiple %4, 128 : i32
    %c0_3 = arith.constant 0 : index
    %6 = arith.index_cast %5 : i32 to index
    %7 = vector.load %arg5[%c0_3, %6] : memref<8x128xf32, #tpu.memory_space<vmem>>, vector<8x128xf32>
    %c0_4 = arith.constant 0 : index
    %c0_5 = arith.constant 0 : index
    %8 = vector.load %arg2[%c0_4, %c0_5] : memref<128x128xf32, #tpu.memory_space<vmem>>, vector<128x128xf32>
    %cst = arith.constant dense<0.000000e+00> : vector<8x128xf32>
    %9 = tpu.matmul %7, %8, %cst {dimension_numbers = #tpu.dot_dimension_numbers<[1], [0], [0], [1], [0, 0, 1, 1], [], []>} : vector<8x128xf32>, vector<128x128xf32>, vector<8x128xf32> -> vector<8x128xf32>
    %c0_6 = arith.constant 0 : index
    %c0_7 = arith.constant 0 : index
    %10 = vector.load %arg3[%c0_6, %c0_7] : memref<8x128xf32, #tpu.memory_space<vmem>>, vector<8x128xf32>
    %cst_8 = arith.constant dense<0.000000e+00> : vector<8x128xf32>
    %11 = tpu.matmul %3, %10, %cst_8 {dimension_numbers = #tpu.dot_dimension_numbers<[1], [0], [0], [1], [0, 0, 1, 1], [], []>} : vector<8x8xf32>, vector<8x128xf32>, vector<8x128xf32> -> vector<8x128xf32>
    %12 = arith.addf %9, %11 : vector<8x128xf32>
    %c0_9 = arith.constant 0 : index
    %13 = arith.index_cast %5 : i32 to index
    %14 = vector.load %arg6[%c0_9, %13] : memref<8x128xf32, #tpu.memory_space<vmem>>, vector<8x128xf32>
    tpu.vector_store %arg6[%c0_9, %13], %12 {strides = array<i32>} : memref<8x128xf32, #tpu.memory_space<vmem>>, vector<8x128xf32>,
    %15 = vector.extract_strided_slice %7 {offsets = [0, 126], sizes = [8, 2], strides = [1, 1]} : vector<8x128xf32> to vector<8x2xf32>
    %16 = vector.extract_strided_slice %12 {offsets = [0, 126], sizes = [8, 2], strides = [1, 1]} : vector<8x128xf32> to vector<8x2xf32>
    %cst_10 = arith.constant 0.000000e+00 : f32
    %17 = vector.broadcast %cst_10 : f32 to vector<8x4xf32>
    %18 = tpu.concatenate %15, %16, %17 in 1 : vector<8x2xf32>, vector<8x2xf32>, vector<8x4xf32> -> vector<8x8xf32>
    %c1_i32 = arith.constant 1 : i32
    %c0_11 = arith.constant 0 : index
    %c0_12 = arith.constant 0 : index
    %19 = vector.load %arg7[%c0_11, %c0_12] : memref<8x8xf32, #tpu.memory_space<vmem>>, vector<8x8xf32>
    tpu.vector_store %arg7[%c0_11, %c0_12], %18 {strides = array<i32>} : memref<8x8xf32, #tpu.memory_space<vmem>>, vector<8x8xf32>,
    return
  }
  func.func @transform_0(%arg0: i32, %arg1: i32) -> (i32, i32) {
    %c0_i32 = arith.constant 0 : i32
    %c0_i32_0 = arith.constant 0 : i32
    %c0_i32_1 = arith.constant 0 : i32
    return %c0_i32, %c0_i32_0 : i32, i32
  }
  func.func @transform_1(%arg0: i32, %arg1: i32) -> (i32, i32) {
    %c0_i32 = arith.constant 0 : i32
    %c0_i32_0 = arith.constant 0 : i32
    %c0_i32_1 = arith.constant 0 : i32
    return %c0_i32, %c0_i32_0 : i32, i32
  }
  func.func @transform_2(%arg0: i32, %arg1: i32) -> (i32, i32) {
    %c0_i32 = arith.constant 0 : i32
    %c0_i32_0 = arith.constant 0 : i32
    return %arg0, %c0_i32 : i32, i32
  }
  func.func @transform_3(%arg0: i32, %arg1: i32) -> (i32, i32) {
    %c0_i32 = arith.constant 0 : i32
    return %arg0, %arg1 : i32, i32
  }
  func.func @transform_4(%arg0: i32, %arg1: i32) -> (i32, i32) {
    %c0_i32 = arith.constant 0 : i32
    return %arg0, %arg1 : i32, i32
  }
}

</mosaic_0001>

<bundles_post_ra>
// kernel: tpu_custom_call.1
= control target key start
LH: loop header
LB: loop body
LE: loop exit
PB: predicated region body
PF: predicated region fallthrough
CT: control target
= control target key end

     0   :  { %9 = vsyncpa [#allocation4], 0  ;;  %s501_s0 = inlined_call_operand.hbm [shape: f32[128,128], index: 0, kind: input, shape index: {}]   ;;  %s502_s1 = inlined_call_operand.hbm [shape: f32[8,128], index: 1, kind: input, shape index: {}]   ;;  %s503_s2 = inlined_call_operand.hbm [shape: f32[8,8], index: 2, kind: input, shape index: {}]   ;;  %s504_s3 = inlined_call_operand.hbm [shape: f32[8,128], index: 3, kind: input, shape index: {}]   ;;  %s505_s4 = inlined_call_operand.hbm [shape: f32[8,128], index: 4, kind: output, shape index: {}]  }
   0x1   :  { %10 = vsyncpa [#allocation7], 0 }
   0x2   :  { %11 = vsyncpa [#allocation10], 0 }
   0x3   :  { %12 = vsyncpa [#allocation5], 0  ;;  %s447_s15 = smov [#allocation6]   ;;  %s448_s17 = smov [#allocation3]  }
   0x4   :  { %s31_s16 = sshll.u32 %s447_s15, 4  ;;  %s18_s18 = sshll.u32 %s448_s17, 4  ;;  %s32_s16 = int_to_ptr.vmem [resolvable:$true] %s31_s16  ;;  %s19_s18 = int_to_ptr.vmem [resolvable:$true] %s18_s18 }
   0x5   :  { %s347_s19 = scalar_lea.vmem %s32_s16, 128  ;;  %p352_p1 = scmp.lt.s32.totalorder %s32_s16, %s32_s16 }
   0x6   :  { %p348_p0 = scmp.ne.s32.totalorder %s32_s16, %s347_s19  ;;  %p353_p2 = scmp.lt.s32.totalorder %s347_s19, %s347_s19 }
   0x8   :  { %p354_p3 = por %p353_p2, %p352_p1 }
   0xa   :  { %p355_p4 = pnand %p354_p3, %p348_p0 }
   0xc   :  { %358 = shalt.err (!%p355_p4)
}
   0xd   :  { %34 = dma.hbm_to_vmem [thread:$0]  %s502_s1, 128, %s32_s16, [#allocation7]  }
   0xe   :  { %s367_s22 = scalar_lea.vmem %s19_s18, 2048  ;;  %p372_p6 = scmp.lt.s32.totalorder %s19_s18, %s19_s18 }
   0xf   :  { %p368_p5 = scmp.ne.s32.totalorder %s19_s18, %s367_s22  ;;  %p373_p7 = scmp.lt.s32.totalorder %s367_s22, %s367_s22 }
  0x11   :  { %p374_p8 = por %p373_p7, %p372_p6 }
  0x13   :  { %p375_p9 = pnand %p374_p8, %p368_p5 }
  0x15   :  { %378 = shalt.err (!%p375_p9)
}
  0x16   :  { %s449_s23 = smov 128   ;;  %s450_s24 = smov 8  }
  0x17   :  { %24 = dma.hbm_to_vmem [thread:$0]  %s501_s0, 2048, %s19_s18, [#allocation4], %s449_s23, %s449_s23, %s450_s24  }
  0x18   :  { %s451_s27 = smov [#allocation8]   ;;  %s452_s29 = smov [#allocation9]  }
  0x19   :  { %s41_s28 = sshll.u32 %s451_s27, 4  ;;  %s51_s30 = sshll.u32 %s452_s29, 4  ;;  %s42_s28 = int_to_ptr.vmem [resolvable:$true] %s41_s28  ;;  %s52_s30 = int_to_ptr.vmem [resolvable:$true] %s51_s30 }
  0x1a   :  { %s387_s1 = scalar_lea.vmem %s42_s28, 128  ;;  %p392_p11 = scmp.lt.s32.totalorder %s42_s28, %s42_s28 }
  0x1b   :  { %p388_p10 = scmp.ne.s32.totalorder %s42_s28, %s387_s1  ;;  %p393_p12 = scmp.lt.s32.totalorder %s387_s1, %s387_s1 }
  0x1d   :  { %p394_p13 = por %p393_p12, %p392_p11 }
  0x1f   :  { %p395_p0 = pnand %p394_p13, %p388_p10 }
  0x21   :  { %398 = shalt.err (!%p395_p0)
}
  0x22   :  { %44 = dma.hbm_to_vmem [thread:$0]  %s503_s2, 128, %s42_s28, [#allocation7]  }
  0x23   :  { %s407_s7 = scalar_lea.vmem %s52_s30, 128  ;;  %p412_p2 = scmp.lt.s32.totalorder %s52_s30, %s52_s30 }
  0x24   :  { %p408_p1 = scmp.ne.s32.totalorder %s52_s30, %s407_s7  ;;  %p413_p3 = scmp.lt.s32.totalorder %s407_s7, %s407_s7 }
  0x26   :  { %p414_p4 = por %p413_p3, %p412_p2 }
  0x28   :  { %p415_p5 = pnand %p414_p4, %p408_p1 }
  0x2a   :  { %418 = shalt.err (!%p415_p5)
}
  0x2b   :  { %54 = dma.hbm_to_vmem [thread:$0]  %s504_s3, 128, %s52_s30, [#allocation10]  }
  0x2c   :  { %439 = dma.done.wait [#allocation4], 2048  }
  0x2d   :  { %440 = vsyncadd [#allocation4], 4294965248 }
  0x2e   :  { %441 = dma.done.wait [#allocation7], 256  }
  0x2f   :  { %442 = vsyncadd [#allocation7], 4294967040 }
  0x30   :  { %443 = dma.done.wait [#allocation10], 128  }
  0x31   :  { %444 = vsyncadd [#allocation10], 4294967168  ;;  %v453_v0 = vmov 0.0   ;;  %vm454_vm0 = vmmov 0   ;;  %v91_v1 = vld [vmem:[#allocation3 + $0x78] sm:$0xff]  ;;  %v90_v2 = vld [vmem:[#allocation3 + $0x70] sm:$0xff] }
  0x32   :  { %293 = vmatprep.subr.mxu1 %v453_v0  ;;  %288 = vmatprep.subr.mxu0 %v453_v0  ;;  %v89_v3 = vld [vmem:[#allocation3 + $0x68] sm:$0xff]  ;;  %vm72_vm1 = vcmask 64512   ;;  %v88_v4 = vld [vmem:[#allocation3 + $0x60] sm:$0xff]  ;;  %v87_v7 = vld [vmem:[#allocation3 + $0x58] sm:$0xff]  ;;  %s455_s2 = smov 2   ;;  %s456_s3 = smov [#allocation11]  }
  0x33   :  { %290 = vmatprep.mubr.msk.f32.mxu0 %vm454_vm0, %v453_v0  ;;  %325 = vmatprep.mubr.msk.f32.mxu1 %vm454_vm0, %v453_v0  ;;  %v92_v5 = vld [vmem:[#allocation6] sm:$0xff]  ;;  %v71_v6 = vld [vmem:[#allocation8] sm:$0xff]  ;;  %v86_v8 = vld [vmem:[#allocation3 + $0x50] sm:$0xff]  ;;  %s257_s9 = sshll.u32 %s456_s3, 4  ;;  %s457_s10 = smov 4   ;;  %s258_s9 = int_to_ptr.vmem [resolvable:$true] %s257_s9 }
  0x34   :  { %294 = vmatpush3.msra.mxu1 %v91_v1  ;;  %289 = vmatpush3.msra.mxu0 %v92_v5  ;;  %73 = vst.msk [vmem:[#allocation2] sm:$0xff] %vm72_vm1, %v71_v6  ;;  %v85_v9 = vld [vmem:[#allocation3 + $0x48] sm:$0xff]  ;;  %v84_v10 = vld [vmem:[#allocation3 + $0x40] sm:$0xff]  ;;  %v83_v12 = vld [vmem:[#allocation3 + $0x38] sm:$0xff]  ;;  %s419_s11 = scalar_lea.vmem %s258_s9, 128  ;;  %p424_p7 = scmp.lt.s32.totalorder %s258_s9, %s258_s9 }
  0x35   :  { %295 = vmatprep.subr.mxu1 %v453_v0  ;;  %v82_v13 = vld [vmem:[#allocation3 + $0x30] sm:$0xff]  ;;  %v81_v14 = vld [vmem:[#allocation3 + $0x28] sm:$0xff]  ;;  %v80_v15 = vld [vmem:[#allocation3 + $0x20] sm:$0xff]  ;;  %p420_p6 = scmp.ne.s32.totalorder %s258_s9, %s419_s11  ;;  %p425_p8 = scmp.lt.s32.totalorder %s419_s11, %s419_s11 }
  0x36   :  { %296 = vmatpush3.msra.mxu1 %v90_v2  ;;  %v79_v16 = vld [vmem:[#allocation3 + $0x18] sm:$0xff]  ;;  %v78_v17 = vld [vmem:[#allocation3 + $0x10] sm:$0xff]  ;;  %v77_v18 = vld [vmem:[#allocation3 + $0x8] sm:$0xff] }
  0x37   :  { %297 = vmatprep.subr.mxu1 %v453_v0  ;;  %v76_v19 = vld [vmem:[#allocation3] sm:$0xff]  ;;  %v75_v20 = vld [vmem:[#allocation9] sm:$0xff]  ;;  %p426_p9 = por %p425_p8, %p424_p7 }
  0x38   :  { %298 = vmatpush3.msra.mxu1 %v89_v3  ;;  %239 = vrot.lane.b32.xlu0 %v75_v20, %s455_s2 }
  0x39   :  { %299 = vmatprep.subr.mxu1 %v453_v0  ;;  %p427_p10 = pnand %p426_p9, %p420_p6 }
  0x3a   :  { %300 = vmatpush3.msra.mxu1 %v88_v4 }
  0x3b   :  { %301 = vmatprep.subr.mxu1 %v453_v0  ;;  %v74_v11 = vld [vmem:[#allocation2] sm:$0xff] }
  0x3c   :  { %302 = vmatpush3.msra.mxu1 %v87_v7  ;;  %291 = vmatmul.mubr.msk.f32.vlgmr.msra.gmra.mxu0 %vm72_vm1, %v74_v11 }
  0x3d   :  { %303 = vmatprep.subr.mxu1 %v453_v0 }
  0x3e   :  { %304 = vmatpush3.msra.mxu1 %v86_v8 }
  0x3f   :  { %305 = vmatprep.subr.mxu1 %v453_v0 }
  0x40   :  { %306 = vmatpush3.msra.mxu1 %v85_v9 }
  0x41   :  { %307 = vmatprep.subr.mxu1 %v453_v0 }
  0x42   :  { %308 = vmatpush3.msra.mxu1 %v84_v10 }
  0x43   :  { %309 = vmatprep.subr.mxu1 %v453_v0 }
  0x44   :  { %310 = vmatpush3.msra.mxu1 %v83_v12 }
  0x45   :  { %311 = vmatprep.subr.mxu1 %v453_v0 }
  0x46   :  { %312 = vmatpush3.msra.mxu1 %v82_v13 }
  0x47   :  { %313 = vmatprep.subr.mxu1 %v453_v0 }
  0x48   :  { %314 = vmatpush3.msra.mxu1 %v81_v14 }
  0x49   :  { %315 = vmatprep.subr.mxu1 %v453_v0 }
  0x4a   :  { %316 = vmatpush3.msra.mxu1 %v80_v15 }
  0x4b   :  { %317 = vmatprep.subr.mxu1 %v453_v0 }
  0x4c   :  { %318 = vmatpush3.msra.mxu1 %v79_v16 }
  0x4d   :  { %319 = vmatprep.subr.mxu1 %v453_v0 }
  0x4e   :  { %320 = vmatpush3.msra.mxu1 %v78_v17 }
  0x4f   :  { %321 = vmatprep.subr.mxu1 %v453_v0 }
  0x50   :  { %322 = vmatpush3.msra.mxu1 %v77_v18 }
  0x51   :  { %323 = vmatprep.subr.mxu1 %v453_v0 }
  0x52   :  { %324 = vmatpush3.msra.mxu1 %v76_v19 }
  0x53   :  { %326 = vmatmul.mubr.f32.vlgmr.msra.gmra.mxu1 %v75_v20 }
  0xfc   :  { %v163_v21 = vpop.f32.mrf.mxu0 }
  0xfe   :  { %v292_v22 = vpop.f32.mrf.mxu0 }
 0x113   :  { %v233_v23 = vpop.f32.mrf.mxu1 }
 0x114   :  { %v234_v24 = vadd.f32 %v233_v23, %v163_v21 }
 0x115   :  { %v327_v25 = vpop.f32.mrf.mxu1 }
 0x116   :  { %237 = vst [vmem:[#allocation11] sm:$0xff] %v234_v24  ;;  %243 = vrot.lane.b32.xlu0 %v234_v24, %s457_s10 }
 0x117   :  { %430 = shalt.err (!%p427_p10)
}
 0x118   :  { %260 = dma.vmem_to_hbm [thread:$0]  %s258_s9, 128, %s505_s4, [#allocation5]   ;;  %v240_v26 = vpop.permute.xlu0 %239  ;;  %vm246_vm2 = vcmask 15360   ;;  %vm248_vm3 = vcmask 31744  }
 0x188   :  { %v244_v27 = vpop.permute.xlu0 %243 }
 0x189   :  { %v247_v28 = vsel %vm246_vm2, %v240_v26, %v244_v27 }
 0x18a   :  { %v249_v29 = vsel %vm248_vm3, %v247_v28, 0.0 }
 0x18b   :  { %250 = vst.msk [vmem:[#allocation2] sm:$0xff] %vm72_vm1, %v249_v29 }
 0x18c   :  { %445 = dma.done.wait [#allocation5], 128  }
 0x18d   :  { %446 = vsyncadd [#allocation5], 4294967168 }
 0x18e   :  { %264 = vsyncpa [#allocation4], 1 }
 0x18f   :  { %265 = vsyncpa [#allocation7], 1 }
 0x190   :  { %266 = vsyncpa [#allocation10], 1 }
 0x191   :  { %267 = vsyncpa [#allocation5], 1 }

</bundles_post_ra>
